<compile_context>
chip_gen: v7x
topology: tpu7x:2x2x1
jax: 0.10.0
libtpu: 0.0.40
codegen_flags: <defaults>
</compile_context>

<pallas_src>
import functools
import math

import jax
import jax.numpy as jnp
from jax.experimental import pallas as pl
from jax.experimental.pallas import tpu as pltpu

_LANE = 128  # lane width (last-dim tiling unit)


def _round_up(x, m):
    return (x + m - 1) // m * m


def _gelu(x, approx):
    if approx:
        # tanh approximation: transcendental goes to the (otherwise idle) EUP slot,
        # relieving the VALU, which is the binding unit for exact erf on v6e/v7x.
        return jax.nn.gelu(x, approximate=True)
    # Exact erf GELU in f32: matches torch.nn.GELU() default numerics.
    return 0.5 * x * (1.0 + jax.lax.erf(x * jnp.float32(1.0 / math.sqrt(2.0))))


def _per_core_vmem_budget_bytes():
    """Per-generation scoped-VMEM cap (leaves headroom for Mosaic internal scratch)."""
    kind = ""
    try:
        kind = jax.devices()[0].device_kind.lower()
    except Exception:
        pass
    if "v5" in kind or "v6" in kind:
        return 100 * 1024 * 1024     # 128 MiB physical VMEM
    return 56 * 1024 * 1024          # v7x (64 MiB physical) / unknown: conservative


def _pick_h_chunk(h_p, th):
    """Largest multiple of 128 that divides h_p and is <= max(th, 128)."""
    th = max(_LANE, (th // _LANE) * _LANE)
    best = _LANE
    c = _LANE
    while c <= min(th, h_p):
        if h_p % c == 0:
            best = c
        c += _LANE
    return best


# ----------------------------------------------------------------------------
# Kernel: one row tile (tm, D_in_p); weights fully VMEM-resident; hidden dim
# processed in chunks of `th` so the f32 GELU intermediate stays small.
# ----------------------------------------------------------------------------
def mlp_kernel(x_ref, w1_ref, b1_ref, w2_ref, b2_ref, o_ref, acc_ref, *,
               th, approx_gelu):
    n_chunks = w1_ref.shape[1] // th  # static

    def chunk(off):
        # fc1 partial: (tm, D_in) @ (D_in, th) on the MXU, f32 accumulation.
        h = jnp.dot(x_ref[...], w1_ref[:, pl.ds(off, th)],
                    preferred_element_type=jnp.float32)
        h = h + b1_ref[:, pl.ds(off, th)].astype(jnp.float32)
        h = _gelu(h, approx_gelu)
        # Dropout(p=0.0) is the identity -> no-op.
        # fc2 partial accumulate: (tm, th) @ (th, D_out) into the f32 scratch.
        acc_ref[...] += jnp.dot(h.astype(w2_ref.dtype),
                                w2_ref[pl.ds(off, th), :],
                                preferred_element_type=jnp.float32)

    acc_ref[...] = jnp.zeros_like(acc_ref)
    if n_chunks <= 8:
        # Static unroll (trip count known at trace time) -> LLO scheduler visibility.
        for c in range(n_chunks):
            chunk(c * th)
    else:
        def body(c, carry):
            chunk(pl.multiple_of(c * th, _LANE))
            return carry
        jax.lax.fori_loop(0, n_chunks, body, 0)

    o_ref[...] = (acc_ref[...] + b2_ref[...].astype(jnp.float32)).astype(o_ref.dtype)


# ----------------------------------------------------------------------------
# One-time (init-time) parameter preparation: pad to lane multiples + cast.
# ----------------------------------------------------------------------------
def prepare_mlp_params(w1, b1, w2, b2, *, mm_dtype=jnp.bfloat16):
    d_in, h = w1.shape
    d_out = w2.shape[1]
    d_in_p = _round_up(d_in, _LANE)
    h_p = _round_up(h, _LANE)
    d_out_p = _round_up(d_out, _LANE)
    return dict(
        w1=jnp.pad(w1, ((0, d_in_p - d_in), (0, h_p - h))).astype(mm_dtype),
        b1=jnp.pad(b1, (0, h_p - h)).reshape(1, h_p).astype(jnp.float32),
        w2=jnp.pad(w2, ((0, h_p - h), (0, d_out_p - d_out))).astype(mm_dtype),
        b2=jnp.pad(b2, (0, d_out_p - d_out)).reshape(1, d_out_p).astype(jnp.float32),
        dims=(d_in, h, d_out),
    )


@functools.partial(
    jax.jit,
    static_argnames=("d_in", "d_out", "tm", "th", "approx_gelu", "out_dtype",
                     "single_buffer_weights", "vmem_budget"))
def _mlp_forward_impl(x, w1_p, b1_p, w2_p, b2_p, *, d_in, d_out, tm, th,
                      approx_gelu, out_dtype, single_buffer_weights, vmem_budget):
    lead_shape = x.shape[:-1]
    M = 1
    for s in lead_shape:
        M *= s

    D_in_p, H_p = w1_p.shape
    D_out_p = w2_p.shape[1]
    mm_dtype = w1_p.dtype
    mmb = jnp.dtype(mm_dtype).itemsize
    ob = jnp.dtype(out_dtype).itemsize

    # ---- row tile: dtype-native sublane multiple, waste-minimizing split ----
    sub = 16 if mmb == 2 else 8
    n_row = max(1, -(-M // max(tm, sub)))
    tm_eff = _round_up(-(-M // n_row), sub)

    # ---- hidden chunk: largest 128-multiple divisor of H_p that is <= th ----
    th_eff = _pick_h_chunk(H_p, th)

    # ---- corrected VMEM accounting + per-generation budget -------------------
    n_wbuf = 1 if single_buffer_weights else 2
    scratch_allowance = 4 * 1024 * 1024  # Mosaic internal scratch / spills

    def need(tm_e, th_e):
        return (2 * tm_e * D_in_p * mmb                     # double-buffered x tile
                + 2 * tm_e * D_out_p * ob                   # double-buffered out tile
                + n_wbuf * (D_in_p * H_p + H_p * D_out_p) * mmb   # resident weights
                + n_wbuf * 8 * (H_p + D_out_p) * 4          # biases ((1,·)->8 sublanes)
                + tm_e * D_out_p * 4                        # f32 accumulator scratch
                + tm_e * th_e * 4                           # f32 hidden chunk (once)
                + scratch_allowance)

    while need(tm_eff, th_eff) > vmem_budget:
        if th_eff > _LANE:
            th_eff = _pick_h_chunk(H_p, th_eff - _LANE)
        elif tm_eff > sub:
            tm_eff = max(sub, _round_up(tm_eff // 2, sub))
        else:
            break

    n_row = -(-M // tm_eff)
    M_p = n_row * tm_eff
    vmem_limit = int(min(max(need(tm_eff, th_eff) * 5 // 4, 16 * 1024 * 1024),
                         vmem_budget))

    # ---- per-call input plumbing (weights already padded/cast at init) ------
    x2 = jnp.pad(x.reshape(M, d_in),
                 ((0, M_p - M), (0, D_in_p - d_in))).astype(mm_dtype)

    def w_spec(shape):
        # Constant index_map -> resident across all grid steps; single-buffer to
        # halve the weights' VMEM footprint.
        if single_buffer_weights:
            return pl.BlockSpec(shape, lambda i: (0, 0),
                                pipeline_mode=pl.Buffered(1))
        return pl.BlockSpec(shape, lambda i: (0, 0))

    cost = pl.CostEstimate(
        flops=2 * M_p * H_p * (D_in_p + D_out_p),
        # Exact erf lowers to a VALU polynomial (not EUP); only the tanh path
        # actually uses transcendentals.
        transcendentals=(M_p * H_p) if approx_gelu else 0,
        bytes_accessed=(M_p * D_in_p * mmb
                        + (D_in_p * H_p + H_p * D_out_p) * mmb
                        + (H_p + D_out_p) * 4
                        + M_p * D_out_p * ob),
    )

    kernel = functools.partial(mlp_kernel, th=th_eff, approx_gelu=approx_gelu)

    out = pl.pallas_call(
        kernel,
        out_shape=jax.ShapeDtypeStruct((M_p, D_out_p), out_dtype),
        grid_spec=pltpu.PrefetchScalarGridSpec(
            num_scalar_prefetch=0,
            grid=(n_row,),
            in_specs=[
                pl.BlockSpec((tm_eff, D_in_p), lambda i: (i, 0)),
                w_spec((D_in_p, H_p)),
                w_spec((1, H_p)),
                w_spec((H_p, D_out_p)),
                w_spec((1, D_out_p)),
            ],
            out_specs=pl.BlockSpec((tm_eff, D_out_p), lambda i: (i, 0)),
            scratch_shapes=[pltpu.VMEM((tm_eff, D_out_p), jnp.float32)],
        ),
        compiler_params=pltpu.CompilerParams(
            dimension_semantics=("parallel",),   # row tiles shard across TCs (v7x)
            vmem_limit_bytes=vmem_limit,
        ),
        cost_estimate=cost,
    )(x2, w1_p, b1_p, w2_p, b2_p)

    return out[:M, :d_out].reshape(*lead_shape, d_out)


def mlp_forward(x, params, *, tm=256, th=512, approx_gelu=False, out_dtype=None,
                single_buffer_weights=True):
    """x: (..., D_in) -> (..., D_out) using init-time-prepared `params`."""
    d_in, _, d_out = params["dims"]
    return _mlp_forward_impl(
        x, params["w1"], params["b1"], params["w2"], params["b2"],
        d_in=d_in, d_out=d_out, tm=tm, th=th, approx_gelu=approx_gelu,
        out_dtype=jnp.dtype(out_dtype or x.dtype),
        single_buffer_weights=single_buffer_weights,
        vmem_budget=_per_core_vmem_budget_bytes())


def run_mlp(x, params, **kwargs):
    """Call the Pallas MLP; only fall back to default (double) weight buffering
    if this JAX build rejects pipeline_mode=pl.Buffered(1)."""
    try:
        return mlp_forward(x, params, single_buffer_weights=True, **kwargs)
    except (TypeError, ValueError, NotImplementedError, pltpu.LoweringException):
        return mlp_forward(x, params, single_buffer_weights=False, **kwargs)


def reference_mlp(x, w1, b1, w2, b2):
    h = jnp.einsum("bnd,dh->bnh", x, w1) + b1
    h = _gelu(h, approx=False)
    return jnp.einsum("bnh,ho->bno", h, w2) + b2


if __name__ == "__main__":
    # Small ViT-like shapes: batch=2, seq=8, in_features=32, hidden=4*32=128
    B, N, D_in = 2, 8, 32
    H = 4 * D_in
    D_out = D_in

    key = jax.random.PRNGKey(0)
    kx, k1, k2, k3, k4 = jax.random.split(key, 5)
    x = jax.random.normal(kx, (B, N, D_in), dtype=jnp.float32)
    w1 = jax.random.normal(k1, (D_in, H), dtype=jnp.float32) * (1.0 / math.sqrt(D_in))
    b1 = jax.random.normal(k2, (H,), dtype=jnp.float32) * 0.01
    w2 = jax.random.normal(k3, (H, D_out), dtype=jnp.float32) * (1.0 / math.sqrt(H))
    b2 = jax.random.normal(k4, (D_out,), dtype=jnp.float32) * 0.01

    ref = reference_mlp(x, w1, b1, w2, b2)

    # 1) full-f32 matmuls + exact erf GELU: must match the reference tightly.
    params_f32 = prepare_mlp_params(w1, b1, w2, b2, mm_dtype=jnp.float32)
    out_f32 = jax.block_until_ready(run_mlp(x, params_f32))
    assert out_f32.shape == (B, N, D_out)
    assert jnp.allclose(out_f32, ref, atol=1e-5, rtol=1e-5), "f32 path mismatch"

    # 2) bf16 matmuls / f32 accumulation (MXU-native), exact GELU.
    params_bf16 = prepare_mlp_params(w1, b1, w2, b2, mm_dtype=jnp.bfloat16)
    out_bf16 = jax.block_until_ready(run_mlp(x, params_bf16))
    assert out_bf16.shape == (B, N, D_out)
    assert jnp.allclose(out_bf16, ref, atol=5e-2, rtol=5e-2), "bf16 path mismatch"

    # 3) fast tanh/EUP GELU path (v6e/v7x VALU relief); looser tolerance.
    out_fast = jax.block_until_ready(run_mlp(x, params_bf16, approx_gelu=True))
    assert out_fast.shape == (B, N, D_out)
    assert jnp.allclose(out_fast, ref, atol=5e-2, rtol=5e-2), "approx-GELU path mismatch"

    print("KERNEL_OK")
</pallas_src>

<mosaic_0001>
module attributes {stable_mosaic.version = 11 : i64} {
  func.func @mlp_kernel(%arg0: i32, %arg1: memref<16x128xf32, #tpu.memory_space<vmem>>, %arg2: memref<128x128xf32, #tpu.memory_space<vmem>>, %arg3: memref<1x128xf32, #tpu.memory_space<vmem>>, %arg4: memref<128x128xf32, #tpu.memory_space<vmem>>, %arg5: memref<1x128xf32, #tpu.memory_space<vmem>>, %arg6: memref<16x128xf32, #tpu.memory_space<vmem>>, %arg7: memref<16x128xf32, #tpu.memory_space<vmem>>) attributes {dimension_semantics = [#tpu.dimension_semantics<parallel>], iteration_bounds = array<i64: 1>, scalar_prefetch = 0 : i64, scratch_operands = 1 : i64, tpu.core_type = #tpu.core_type<tc>, window_params = [{transform_indices = @transform_0, window_bounds = array<i64: 16, 128>}, {pipeline_mode = #tpu.pipeline_mode<synchronous>, transform_indices = @transform_1, window_bounds = array<i64: 128, 128>}, {pipeline_mode = #tpu.pipeline_mode<synchronous>, transform_indices = @transform_2, window_bounds = array<i64: 1, 128>}, {pipeline_mode = #tpu.pipeline_mode<synchronous>, transform_indices = @transform_3, window_bounds = array<i64: 128, 128>}, {pipeline_mode = #tpu.pipeline_mode<synchronous>, transform_indices = @transform_4, window_bounds = array<i64: 1, 128>}, {transform_indices = @transform_5, window_bounds = array<i64: 16, 128>}]} {
    %cst = arith.constant 0.000000e+00 : f32
    %0 = vector.broadcast %cst : f32 to vector<16x128xf32>
    %c0 = arith.constant 0 : index
    %c0_0 = arith.constant 0 : index
    %1 = vector.load %arg7[%c0, %c0_0] : memref<16x128xf32, #tpu.memory_space<vmem>>, vector<16x128xf32>
    tpu.vector_store %arg7[%c0, %c0_0], %0 {strides = array<i32>} : memref<16x128xf32, #tpu.memory_space<vmem>>, vector<16x128xf32>,
    %c0_1 = arith.constant 0 : index
    %c0_2 = arith.constant 0 : index
    %2 = vector.load %arg1[%c0_1, %c0_2] : memref<16x128xf32, #tpu.memory_space<vmem>>, vector<16x128xf32>
    %c0_3 = arith.constant 0 : index
    %c0_4 = arith.constant 0 : index
    %3 = vector.load %arg2[%c0_3, %c0_4] : memref<128x128xf32, #tpu.memory_space<vmem>>, vector<128x128xf32>
    %cst_5 = arith.constant dense<0.000000e+00> : vector<16x128xf32>
    %4 = tpu.matmul %2, %3, %cst_5 {dimension_numbers = #tpu.dot_dimension_numbers<[1], [0], [0], [1], [0, 0, 1, 1], [], []>} : vector<16x128xf32>, vector<128x128xf32>, vector<16x128xf32> -> vector<16x128xf32>
    %c0_6 = arith.constant 0 : index
    %c0_7 = arith.constant 0 : index
    %5 = vector.load %arg3[%c0_6, %c0_7] : memref<1x128xf32, #tpu.memory_space<vmem>>, vector<1x128xf32>
    %6 = vector.broadcast %5 : vector<1x128xf32> to vector<16x128xf32>
    %7 = arith.addf %4, %6 : vector<16x128xf32>
    %cst_8 = arith.constant 5.000000e-01 : f32
    %8 = vector.broadcast %cst_8 : f32 to vector<16x128xf32>
    %9 = arith.mulf %8, %7 : vector<16x128xf32>
    %cst_9 = arith.constant 0.707106769 : f32
    %10 = vector.broadcast %cst_9 : f32 to vector<16x128xf32>
    %11 = arith.mulf %7, %10 : vector<16x128xf32>
    %12 = math.erf %11 : vector<16x128xf32>
    %cst_10 = arith.constant 1.000000e+00 : f32
    %13 = vector.broadcast %cst_10 : f32 to vector<16x128xf32>
    %14 = arith.addf %13, %12 : vector<16x128xf32>
    %15 = arith.mulf %9, %14 : vector<16x128xf32>
    %c0_11 = arith.constant 0 : index
    %c0_12 = arith.constant 0 : index
    %16 = vector.load %arg7[%c0_11, %c0_12] : memref<16x128xf32, #tpu.memory_space<vmem>>, vector<16x128xf32>
    %c0_13 = arith.constant 0 : index
    %c0_14 = arith.constant 0 : index
    %17 = vector.load %arg4[%c0_13, %c0_14] : memref<128x128xf32, #tpu.memory_space<vmem>>, vector<128x128xf32>
    %cst_15 = arith.constant dense<0.000000e+00> : vector<16x128xf32>
    %18 = tpu.matmul %15, %17, %cst_15 {dimension_numbers = #tpu.dot_dimension_numbers<[1], [0], [0], [1], [0, 0, 1, 1], [], []>} : vector<16x128xf32>, vector<128x128xf32>, vector<16x128xf32> -> vector<16x128xf32>
    %19 = arith.addf %16, %18 : vector<16x128xf32>
    %c0_16 = arith.constant 0 : index
    %c0_17 = arith.constant 0 : index
    %20 = vector.load %arg7[%c0_16, %c0_17] : memref<16x128xf32, #tpu.memory_space<vmem>>, vector<16x128xf32>
    tpu.vector_store %arg7[%c0_16, %c0_17], %19 {strides = array<i32>} : memref<16x128xf32, #tpu.memory_space<vmem>>, vector<16x128xf32>,
    %c0_18 = arith.constant 0 : index
    %c0_19 = arith.constant 0 : index
    %21 = vector.load %arg7[%c0_18, %c0_19] : memref<16x128xf32, #tpu.memory_space<vmem>>, vector<16x128xf32>
    %c0_20 = arith.constant 0 : index
    %c0_21 = arith.constant 0 : index
    %22 = vector.load %arg5[%c0_20, %c0_21] : memref<1x128xf32, #tpu.memory_space<vmem>>, vector<1x128xf32>
    %23 = vector.broadcast %22 : vector<1x128xf32> to vector<16x128xf32>
    %24 = arith.addf %21, %23 : vector<16x128xf32>
    %c0_22 = arith.constant 0 : index
    %c0_23 = arith.constant 0 : index
    %25 = vector.load %arg6[%c0_22, %c0_23] : memref<16x128xf32, #tpu.memory_space<vmem>>, vector<16x128xf32>
    tpu.vector_store %arg6[%c0_22, %c0_23], %24 {strides = array<i32>} : memref<16x128xf32, #tpu.memory_space<vmem>>, vector<16x128xf32>,
    return
  }
  func.func @transform_0(%arg0: i32) -> (i32, i32) {
    %c0_i32 = arith.constant 0 : i32
    %c0_i32_0 = arith.constant 0 : i32
    return %arg0, %c0_i32 : i32, i32
  }
  func.func @transform_1(%arg0: i32) -> (i32, i32) {
    %c0_i32 = arith.constant 0 : i32
    %c0_i32_0 = arith.constant 0 : i32
    %c0_i32_1 = arith.constant 0 : i32
    return %c0_i32, %c0_i32_0 : i32, i32
  }
  func.func @transform_2(%arg0: i32) -> (i32, i32) {
    %c0_i32 = arith.constant 0 : i32
    %c0_i32_0 = arith.constant 0 : i32
    %c0_i32_1 = arith.constant 0 : i32
    return %c0_i32, %c0_i32_0 : i32, i32
  }
  func.func @transform_3(%arg0: i32) -> (i32, i32) {
    %c0_i32 = arith.constant 0 : i32
    %c0_i32_0 = arith.constant 0 : i32
    %c0_i32_1 = arith.constant 0 : i32
    return %c0_i32, %c0_i32_0 : i32, i32
  }
  func.func @transform_4(%arg0: i32) -> (i32, i32) {
    %c0_i32 = arith.constant 0 : i32
    %c0_i32_0 = arith.constant 0 : i32
    %c0_i32_1 = arith.constant 0 : i32
    return %c0_i32, %c0_i32_0 : i32, i32
  }
  func.func @transform_5(%arg0: i32) -> (i32, i32) {
    %c0_i32 = arith.constant 0 : i32
    %c0_i32_0 = arith.constant 0 : i32
    return %arg0, %c0_i32 : i32, i32
  }
}

</mosaic_0001>

<bundles_post_ra>
// kernel: _mlp_forward_impl.1
= control target key start
LH: loop header
LB: loop body
LE: loop exit
PB: predicated region body
PF: predicated region fallthrough
CT: control target
= control target key end

     0   :  { %10 = vsyncpa [#allocation4], 0  ;;  %s580_s0 = inlined_call_operand.vmem [shape: f32[16,128], index: 0, kind: input, shape index: {}]   ;;  %s581_s1 = inlined_call_operand.hbm [shape: f32[128,128], index: 1, kind: input, shape index: {}]   ;;  %s582_s2 = inlined_call_operand.vmem [shape: f32[1,128], index: 2, kind: input, shape index: {}]   ;;  %s583_s3 = inlined_call_operand.hbm [shape: f32[128,128], index: 3, kind: input, shape index: {}]   ;;  %s584_s4 = inlined_call_operand.vmem [shape: f32[1,128], index: 4, kind: input, shape index: {}]   ;;  %s585_s5 = inlined_call_operand.vmem [shape: f32[16,128], index: 5, kind: output, shape index: {}]  }
   0x1   :  { %11 = vsyncpa [#allocation6], 0  ;;  %s504_s18 = smov [#allocation3]   ;;  %s456_s22 = scalar_lea.hbm %s581_s1, 2048 }
   0x2   :  { %s19_s19 = sshll.u32 %s504_s18, 4  ;;  %p457_p0 = scmp.ne.s32.totalorder %s581_s1, %s456_s22  ;;  %s20_s19 = int_to_ptr.vmem [resolvable:$true] %s19_s19 }
   0x3   :  { %p460_p1 = scmp.lt.u32.totalorder %s456_s22, %s581_s1 }
   0x5   :  { %p462_p2 = pnand %p460_p1, %p457_p0 }
   0x7   :  { %465 = shalt.err (!%p462_p2)
}
   0x8   :  { %s466_s27 = scalar_lea.vmem %s20_s19, 2048  ;;  %p471_p4 = scmp.lt.s32.totalorder %s20_s19, %s20_s19 }
   0x9   :  { %p467_p3 = scmp.ne.s32.totalorder %s20_s19, %s466_s27  ;;  %p472_p5 = scmp.lt.s32.totalorder %s466_s27, %s466_s27 }
   0xb   :  { %p473_p6 = por %p472_p5, %p471_p4 }
   0xd   :  { %p474_p7 = pnand %p473_p6, %p467_p3 }
   0xf   :  { %477 = shalt.err (!%p474_p7)
}
  0x10   :  { %s505_s28 = smov 128   ;;  %s506_s29 = smov 8  }
  0x11   :  { %25 = dma.hbm_to_vmem [thread:$0]  %s581_s1, 2048, %s20_s19, [#allocation4], %s505_s28, %s505_s28, %s506_s29  }
  0x12   :  { %s507_s7 = smov [#allocation5]   ;;  %s478_s11 = scalar_lea.hbm %s583_s3, 2048 }
  0x13   :  { %s33_s8 = sshll.u32 %s507_s7, 4  ;;  %p479_p8 = scmp.ne.s32.totalorder %s583_s3, %s478_s11  ;;  %s34_s8 = int_to_ptr.vmem [resolvable:$true] %s33_s8 }
  0x14   :  { %p482_p9 = scmp.lt.u32.totalorder %s478_s11, %s583_s3 }
  0x16   :  { %p484_p10 = pnand %p482_p9, %p479_p8 }
  0x18   :  { %487 = shalt.err (!%p484_p10)
}
  0x19   :  { %s488_s16 = scalar_lea.vmem %s34_s8, 2048  ;;  %p493_p12 = scmp.lt.s32.totalorder %s34_s8, %s34_s8 }
  0x1a   :  { %p489_p11 = scmp.ne.s32.totalorder %s34_s8, %s488_s16  ;;  %p494_p13 = scmp.lt.s32.totalorder %s488_s16, %s488_s16 }
  0x1c   :  { %p495_p0 = por %p494_p13, %p493_p12 }
  0x1e   :  { %p496_p1 = pnand %p495_p0, %p489_p11 }
  0x20   :  { %499 = shalt.err (!%p496_p1)
}
  0x21   :  { %39 = dma.hbm_to_vmem [thread:$0]  %s583_s3, 2048, %s34_s8, [#allocation6], %s505_s28, %s505_s28, %s506_s29  }
  0x22   :  { %500 = dma.done.wait [#allocation4], 2048  }
  0x23   :  { %501 = vsyncadd [#allocation4], 4294965248 }
  0x24   :  { %502 = dma.done.wait [#allocation6], 2048  }
  0x25   :  { %503 = vsyncadd [#allocation6], 4294965248  ;;  %v52_v0 = vld [vmem:[#allocation3] sm:$0xff]  ;;  %v53_v1 = vld [vmem:[#allocation3 + $0x8] sm:$0xff] }
  0x26   :  { %v54_v2 = vld [vmem:[#allocation3 + $0x10] sm:$0xff]  ;;  %v384_v3 = vpack.c.bf16 %v53_v1, %v52_v0  ;;  %v55_v4 = vld [vmem:[#allocation3 + $0x18] sm:$0xff]  ;;  %v56_v6 = vld [vmem:[#allocation3 + $0x20] sm:$0xff] }
  0x27   :  { %v388_v5 = vpack.c.bf16 %v55_v4, %v54_v2  ;;  %v57_v7 = vld [vmem:[#allocation3 + $0x28] sm:$0xff]  ;;  %v58_v9 = vld [vmem:[#allocation3 + $0x30] sm:$0xff]  ;;  %v59_v10 = vld [vmem:[#allocation3 + $0x38] sm:$0xff] }
  0x28   :  { %385 = vmatprep.subr.bf16.mxu0 %v384_v3  ;;  %v392_v8 = vpack.c.bf16 %v57_v7, %v56_v6  ;;  %v50_v11 = vld [vmem:[%s580_s0] sm:$0xff]  ;;  %v163_v13 = vld [vmem:[#allocation5 + $0x8] sm:$0xff]  ;;  %v164_v14 = vld [vmem:[#allocation5 + $0x10] sm:$0xff]  ;;  %v396_v20 = vpack.c.bf16 %v59_v10, %v58_v9 }
  0x29   :  { %387 = vmatpush3.bf16.msra.mxu0 %v384_v3  ;;  %346 = vmatprep.mubr.f32.mxu0 %v50_v11  ;;  %v162_v12 = vld [vmem:[#allocation5] sm:$0xff]  ;;  %v165_v16 = vld [vmem:[#allocation5 + $0x18] sm:$0xff]  ;;  %v167_v19 = vld [vmem:[#allocation5 + $0x28] sm:$0xff] }
  0x2a   :  { %389 = vmatprep.subr.bf16.mxu0 %v388_v5  ;;  %v416_v15 = vpack.c.bf16 %v163_v13, %v162_v12  ;;  %v420_v17 = vpack.c.bf16 %v165_v16, %v164_v14  ;;  %v166_v18 = vld [vmem:[#allocation5 + $0x20] sm:$0xff]  ;;  %v61_v22 = vld [vmem:[#allocation3 + $0x48] sm:$0xff]  ;;  %v62_v25 = vld [vmem:[#allocation3 + $0x50] sm:$0xff] }
  0x2b   :  { %v60_v21 = vld [vmem:[#allocation3 + $0x40] sm:$0xff]  ;;  %v424_v23 = vpack.c.bf16 %v167_v19, %v166_v18  ;;  %v63_v26 = vld [vmem:[#allocation3 + $0x58] sm:$0xff]  ;;  %v65_v29 = vld [vmem:[#allocation3 + $0x68] sm:$0xff] }
  0x2c   :  { %417 = vmatprep.subr.bf16.mxu1 %v416_v15  ;;  %v400_v24 = vpack.c.bf16 %v61_v22, %v60_v21  ;;  %v404_v27 = vpack.c.bf16 %v63_v26, %v62_v25  ;;  %v64_v28 = vld [vmem:[#allocation3 + $0x60] sm:$0xff]  ;;  %v66_v31 = vld [vmem:[#allocation3 + $0x70] sm:$0xff]  ;;  %v67_v32 = vld [vmem:[#allocation3 + $0x78] sm:$0xff] }
  0x2d   :  { %391 = vmatpush3.bf16.msra.mxu0 %v388_v5  ;;  %419 = vmatpush3.bf16.msra.mxu1 %v416_v15  ;;  %v408_v30 = vpack.c.bf16 %v65_v29, %v64_v28  ;;  %v412_v33 = vpack.c.bf16 %v67_v32, %v66_v31  ;;  %v51_v34 = vld [vmem:[%s580_s0 + $0x8] sm:$0xff]  ;;  %v168_v35 = vld [vmem:[#allocation5 + $0x30] sm:$0xff]  ;;  %v169_v36 = vld [vmem:[#allocation5 + $0x38] sm:$0xff] }
  0x2e   :  { %393 = vmatprep.subr.bf16.mxu0 %v392_v8  ;;  %421 = vmatprep.subr.bf16.mxu1 %v420_v17  ;;  %v428_v37 = vpack.c.bf16 %v169_v36, %v168_v35  ;;  %v170_v38 = vld [vmem:[#allocation5 + $0x40] sm:$0xff]  ;;  %v171_v39 = vld [vmem:[#allocation5 + $0x48] sm:$0xff]  ;;  %v172_v41 = vld [vmem:[#allocation5 + $0x50] sm:$0xff] }
  0x2f   :  { %v432_v40 = vpack.c.bf16 %v171_v39, %v170_v38  ;;  %v173_v42 = vld [vmem:[#allocation5 + $0x58] sm:$0xff]  ;;  %v174_v44 = vld [vmem:[#allocation5 + $0x60] sm:$0xff]  ;;  %v175_v45 = vld [vmem:[#allocation5 + $0x68] sm:$0xff] }
  0x30   :  { %v436_v43 = vpack.c.bf16 %v173_v42, %v172_v41  ;;  %v440_v46 = vpack.c.bf16 %v175_v45, %v174_v44  ;;  %v176_v47 = vld [vmem:[#allocation5 + $0x70] sm:$0xff]  ;;  %v177_v48 = vld [vmem:[#allocation5 + $0x78] sm:$0xff]  ;;  %v276_v50 = vld [vmem:[%s582_s2] ss:$0 sm:$0xff] }
  0x31   :  { %395 = vmatpush3.bf16.msra.mxu0 %v392_v8  ;;  %423 = vmatpush3.bf16.msra.mxu1 %v420_v17  ;;  %v444_v49 = vpack.c.bf16 %v177_v48, %v176_v47  ;;  %v277_v1 = vld [vmem:[%s584_s4] ss:$0 sm:$0xff] }
  0x32   :  { %397 = vmatprep.subr.bf16.mxu0 %v396_v20  ;;  %425 = vmatprep.subr.bf16.mxu1 %v424_v23 }
  0x35   :  { %399 = vmatpush3.bf16.msra.mxu0 %v396_v20  ;;  %427 = vmatpush3.bf16.msra.mxu1 %v424_v23 }
  0x36   :  { %401 = vmatprep.subr.bf16.mxu0 %v400_v24  ;;  %429 = vmatprep.subr.bf16.mxu1 %v428_v37 }
  0x39   :  { %403 = vmatpush3.bf16.msra.mxu0 %v400_v24  ;;  %431 = vmatpush3.bf16.msra.mxu1 %v428_v37 }
  0x3a   :  { %405 = vmatprep.subr.bf16.mxu0 %v404_v27  ;;  %433 = vmatprep.subr.bf16.mxu1 %v432_v40 }
  0x3d   :  { %407 = vmatpush3.bf16.msra.mxu0 %v404_v27  ;;  %435 = vmatpush3.bf16.msra.mxu1 %v432_v40 }
  0x3e   :  { %409 = vmatprep.subr.bf16.mxu0 %v408_v30  ;;  %437 = vmatprep.subr.bf16.mxu1 %v436_v43 }
  0x41   :  { %411 = vmatpush3.bf16.msra.mxu0 %v408_v30  ;;  %439 = vmatpush3.bf16.msra.mxu1 %v436_v43 }
  0x42   :  { %413 = vmatprep.subr.bf16.mxu0 %v412_v33  ;;  %441 = vmatprep.subr.bf16.mxu1 %v440_v46 }
  0x45   :  { %415 = vmatpush3.bf16.msra.mxu0 %v412_v33  ;;  %443 = vmatpush3.bf16.msra.mxu1 %v440_v46 }
  0x46   :  { %445 = vmatprep.subr.bf16.mxu1 %v444_v49 }
  0x48   :  { %347 = vmatmul.mubr.f32.vlgmr.msra.gmra.mrb[0].mxu0 %v51_v34 }
  0x49   :  { %447 = vmatpush3.bf16.msra.mxu1 %v444_v49 }
 0x11b   :  { %v348_v51 = vpop.f32.mrb[0].mxu0 }
 0x11c   :  { %v147_v52 = vadd.f32 %v348_v51, %v276_v50  ;;  %v141_v53 = vpop.f32.mrb[1].mxu0 }
 0x11d   :  { %v142_v54 = vadd.f32 %v276_v50, %v141_v53 }
 0x11e   :  { %v153_v55 = vmul.f32 0.70710677, %v147_v52  ;;  %v151_v62 = vmul.f32 0.5, %v147_v52 }
 0x11f   :  { %v152_v56 = vmul.f32 0.70710677, %v142_v54  ;;  %v150_v60 = vmul.f32 0.5, %v142_v54 }
 0x120   :  { %452 = verf.f32 %v153_v55 }
 0x121   :  { %454 = verf.f32 %v152_v56 }
 0x12a   :  { %v453_v57 = vpop.eup %452 }
 0x12b   :  { %v455_v58 = vpop.eup %454  ;;  %v157_v59 = vadd.f32 1.0, %v453_v57 }
 0x12c   :  { %v156_v61 = vadd.f32 1.0, %v455_v58 }
 0x12d   :  { %v159_v0 = vmul.f32 %v157_v59, %v151_v62 }
 0x12e   :  { %v158_v63 = vmul.f32 %v156_v61, %v150_v60 }
 0x130   :  { %381 = vmatprep.mubr.f32.mxu1 %v158_v63 }
 0x131   :  { %382 = vmatmul.mubr.f32.vlgmr.msra.gmra.mrb[0].mxu1 %v159_v0 }
 0x204   :  { %v383_v2 = vpop.f32.mrb[0].mxu1 }
 0x205   :  { %v267_v3 = vadd.f32 %v383_v2, %v277_v1  ;;  %v244_v4 = vpop.f32.mrb[1].mxu1 }
 0x206   :  { %v266_v5 = vadd.f32 %v277_v1, %v244_v4 }
 0x207   :  { %269 = vst [vmem:[%s585_s5 + $0x8] sm:$0xff] %v267_v3 }
 0x208   :  { %268 = vst [vmem:[%s585_s5] sm:$0xff] %v266_v5 }
 0x209   :  { %274 = vsyncpa [#allocation4], 1 }
 0x20a   :  { %275 = vsyncpa [#allocation6], 1 }

</bundles_post_ra>
